<compile_context>
chip_gen: v7x
topology: tpu7x:2x2x1
jax: 0.10.0
libtpu: 0.0.40
codegen_flags: <defaults>
</compile_context>

<pallas_src>
import functools

import jax
import jax.numpy as jnp
from jax.experimental import pallas as pl
from jax.experimental.pallas import tpu as pltpu


def _round_up(x, m):
    return (x + m - 1) // m * m


def _vmem_capacity_bytes():
    """Physical VMEM of the local TPU; conservative fallback if unknown."""
    try:
        return int(pltpu.get_tpu_info().vmem_capacity_bytes)
    except Exception:
        return 64 << 20  # assume v7x-sized VMEM if the query is unavailable


def _triplet_kernel(a_ref, p_ref, n_ref, out_ref, ap_acc, an_acc, *,
                    margin, d_total, td):
    """Per-tile body. Grid = (batch_tiles, feature_tiles); axis 1 reduces."""
    k = pl.program_id(1)

    @pl.when(k == 0)
    def _():
        ap_acc[...] = jnp.zeros_like(ap_acc)
        an_acc[...] = jnp.zeros_like(an_acc)

    a = a_ref[...].astype(jnp.float32)
    p = p_ref[...].astype(jnp.float32)
    n = n_ref[...].astype(jnp.float32)

    d_ap = a - p
    d_an = a - n

    if d_total % td != 0:
        # Ragged feature tail: zero out-of-range columns of the last tile
        # before squaring (non-last tiles are fully in range, mask all-true).
        # Cheap VPU work, free under the HBM roofline; no wrapper jnp.pad.
        col = jax.lax.broadcasted_iota(jnp.int32, d_ap.shape, dimension=1)
        valid = col < (d_total - k * td)
        d_ap = jnp.where(valid, d_ap, 0.0)
        d_an = jnp.where(valid, d_an, 0.0)

    ap_acc[...] += jnp.sum(d_ap * d_ap, axis=-1, keepdims=True)
    an_acc[...] += jnp.sum(d_an * d_an, axis=-1, keepdims=True)

    @pl.when(k == pl.num_programs(1) - 1)
    def _():
        loss = jnp.sqrt(ap_acc[...]) - jnp.sqrt(an_acc[...]) + margin
        out_ref[...] = jnp.maximum(loss, 0.0)


def _triplet_rows_pallas(a, p, n, margin, block_b, block_d):
    """Row-wise triplet loss over 2-D (B, D) inputs via pallas_call."""
    B, D = a.shape
    in_itemsize = jnp.dtype(a.dtype).itemsize
    vmem_cap = _vmem_capacity_bytes()
    budget = int(0.70 * vmem_cap)

    if block_b is not None:
        tb = max(8, _round_up(int(block_b), 8))
    else:
        # Aim for >= 2 batch tiles so dimension_semantics=("parallel", ...)
        # can split the batch axis across v7x's two TensorCores.
        tb = min(_round_up(max(-(-B // 2), 1), 8), 512)

    if block_d is not None:
        td = max(128, _round_up(int(block_d), 128))
    else:
        # Larger feature tiles on 128-MiB-VMEM parts (v5e/v6e); 2048 on v7x.
        td_cap = 4096 if vmem_cap >= (96 << 20) else 2048
        td = min(_round_up(D, 128), td_cap)

    def footprint(tb_, td_):
        return (3 * 2 * tb_ * td_ * in_itemsize   # 3 inputs, double buffered
                + 2 * tb_ * 128 * 4               # (tb,1) f32 out block, lane-padded, x2
                + 2 * tb_ * 128 * 4               # two f32 accumulators, lane-padded
                + (2 << 20))                      # compiler slack

    # Shrink (user-supplied or default) tiles that would exceed this
    # generation's VMEM budget rather than failing at compile time.
    while footprint(tb, td) > budget and td > 128:
        td = max(128, _round_up(td // 2, 128))
    while footprint(tb, td) > budget and tb > 8:
        tb = max(8, _round_up(tb // 2, 8))

    vmem_limit = int(min(max(footprint(tb, td), 16 << 20), budget))
    grid = (pl.cdiv(B, tb), pl.cdiv(D, td))

    kernel = functools.partial(_triplet_kernel, margin=float(margin),
                               d_total=D, td=td)

    out = pl.pallas_call(
        kernel,
        out_shape=jax.ShapeDtypeStruct((B, 1), jnp.float32),
        grid_spec=pltpu.PrefetchScalarGridSpec(
            num_scalar_prefetch=0,
            grid=grid,
            in_specs=[
                pl.BlockSpec((tb, td), lambda i, k: (i, k)),
                pl.BlockSpec((tb, td), lambda i, k: (i, k)),
                pl.BlockSpec((tb, td), lambda i, k: (i, k)),
            ],
            out_specs=pl.BlockSpec((tb, 1), lambda i, k: (i, 0)),
            scratch_shapes=[pltpu.VMEM((tb, 1), jnp.float32),
                            pltpu.VMEM((tb, 1), jnp.float32)],
        ),
        compiler_params=pltpu.CompilerParams(
            dimension_semantics=("parallel", "arbitrary"),
            vmem_limit_bytes=vmem_limit,
        ),
    )(a, p, n)

    return out[:, 0]  # (B,) float32


def _triplet_rows_xla(a, p, n, margin):
    """Fused-XLA fallback for tiny inputs (launch cost > bandwidth cost)."""
    a = a.astype(jnp.float32)
    p = p.astype(jnp.float32)
    n = n.astype(jnp.float32)
    d_ap = jnp.sqrt(jnp.sum((a - p) ** 2, axis=-1))
    d_an = jnp.sqrt(jnp.sum((a - n) ** 2, axis=-1))
    return jnp.maximum(d_ap - d_an + margin, 0.0)


def triplet_loss(anchor, positive, negative, margin=1.0, *,
                 block_b=None, block_d=None, force_pallas=None):
    """TripletLoss.forward with L2 distance, faithful to the module's quirks.

    `len(anchor) > 2` (i.e. batch size > 2) with >2-D inputs -> flatten to
    (B, -1) and return a (B,) loss.  Otherwise the distance is taken over the
    last dim only, so the loss has shape anchor.shape[:-1].
    """
    if anchor.shape != positive.shape or anchor.shape != negative.shape:
        raise ValueError("anchor/positive/negative must share a shape; got "
                         f"{anchor.shape}, {positive.shape}, {negative.shape}")
    if anchor.ndim == 0:
        raise ValueError("TripletLoss needs at least 1-D inputs.")

    if anchor.ndim > 2 and anchor.shape[0] > 2:
        a2 = anchor.reshape(anchor.shape[0], -1)
        p2 = positive.reshape(positive.shape[0], -1)
        n2 = negative.reshape(negative.shape[0], -1)
        out_shape = (anchor.shape[0],)
    else:
        a2 = anchor.reshape(-1, anchor.shape[-1])
        p2 = positive.reshape(-1, positive.shape[-1])
        n2 = negative.reshape(-1, negative.shape[-1])
        out_shape = anchor.shape[:-1]

    B, D = a2.shape
    tiny = 3 * B * D * jnp.dtype(a2.dtype).itemsize < (1 << 20)
    use_pallas = force_pallas if force_pallas is not None else not tiny

    if use_pallas:
        rows = _triplet_rows_pallas(a2, p2, n2, margin, block_b, block_d)
    else:
        rows = _triplet_rows_xla(a2, p2, n2, margin)

    return rows.reshape(out_shape).astype(anchor.dtype)


def _reference(anchor, positive, negative, margin=1.0):
    if anchor.ndim > 2 and anchor.shape[0] > 2:
        anchor = anchor.reshape(anchor.shape[0], -1)
        positive = positive.reshape(positive.shape[0], -1)
        negative = negative.reshape(negative.shape[0], -1)
    a = anchor.astype(jnp.float32)
    p = positive.astype(jnp.float32)
    n = negative.astype(jnp.float32)
    d_ap = jnp.sqrt(jnp.sum((a - p) ** 2, axis=-1))
    d_an = jnp.sqrt(jnp.sum((a - n) ** 2, axis=-1))
    return jnp.maximum(d_ap - d_an + margin, 0.0)


if __name__ == "__main__":
    margin = 1.0

    # --- primary example: small conv-style NCHW embeddings, batch > 2 ------
    B, C, H, W = 4, 4, 16, 16
    k1, k2, k3 = jax.random.split(jax.random.PRNGKey(0), 3)
    anchor = jax.random.normal(k1, (B, C, H, W), dtype=jnp.float32)
    positive = jax.random.normal(k2, (B, C, H, W), dtype=jnp.float32)
    negative = jax.random.normal(k3, (B, C, H, W), dtype=jnp.float32)

    loss = jax.block_until_ready(
        triplet_loss(anchor, positive, negative, margin, force_pallas=True))
    ref = _reference(anchor, positive, negative, margin)
    assert loss.shape == (B,)
    assert loss.dtype == anchor.dtype
    assert jnp.allclose(loss, ref, atol=1e-5, rtol=1e-5), (loss, ref)

    # Auto mode routes this tiny input to the fused XLA fallback; same result.
    loss_auto = jax.block_until_ready(
        triplet_loss(anchor, positive, negative, margin))
    assert jnp.allclose(loss_auto, ref, atol=1e-5, rtol=1e-5)

    # --- unaligned (13, 1000): in-kernel ragged-tail mask (no jnp.pad),
    #     2 batch tiles, multi-tile feature reduction ------------------------
    k4, k5, k6 = jax.random.split(jax.random.PRNGKey(1), 3)
    B2, D2 = 13, 1000
    a2 = jax.random.normal(k4, (B2, D2), dtype=jnp.float32)
    p2 = jax.random.normal(k5, (B2, D2), dtype=jnp.float32)
    n2 = jax.random.normal(k6, (B2, D2), dtype=jnp.float32)
    loss2 = jax.block_until_ready(
        triplet_loss(a2, p2, n2, margin, block_d=256, force_pallas=True))
    ref2 = _reference(a2, p2, n2, margin)
    assert loss2.shape == (B2,)
    assert jnp.allclose(loss2, ref2, atol=1e-5, rtol=1e-5), (loss2, ref2)

    # --- bf16 inputs: half the HBM bytes on the wire, f32 accumulation ------
    ab = anchor.astype(jnp.bfloat16)
    pb = positive.astype(jnp.bfloat16)
    nb = negative.astype(jnp.bfloat16)
    loss3 = jax.block_until_ready(
        triplet_loss(ab, pb, nb, margin, force_pallas=True))
    ref3 = _reference(ab.astype(jnp.float32), pb.astype(jnp.float32),
                      nb.astype(jnp.float32), margin)
    assert loss3.dtype == jnp.bfloat16
    assert jnp.allclose(loss3.astype(jnp.float32), ref3, atol=5e-2, rtol=5e-2)

    # --- quirky module path: batch <= 2 with >2-D inputs -> no flatten,
    #     distance over the last dim only (loss shape = shape[:-1]) ----------
    kq1, kq2, kq3 = jax.random.split(jax.random.PRNGKey(2), 3)
    aq = jax.random.normal(kq1, (2, 4, 16, 16), dtype=jnp.float32)
    pq = jax.random.normal(kq2, (2, 4, 16, 16), dtype=jnp.float32)
    nq = jax.random.normal(kq3, (2, 4, 16, 16), dtype=jnp.float32)
    lossq = jax.block_until_ready(triplet_loss(aq, pq, nq, margin))
    refq = _reference(aq, pq, nq, margin)
    assert lossq.shape == (2, 4, 16)
    assert jnp.allclose(lossq, refq, atol=1e-5, rtol=1e-5)

    print("KERNEL_OK")
</pallas_src>

<mosaic_0001>
module attributes {stable_mosaic.version = 11 : i64} {
  func.func @_triplet_kernel(%arg0: i32, %arg1: i32, %arg2: memref<8x1024xf32, #tpu.memory_space<vmem>>, %arg3: memref<8x1024xf32, #tpu.memory_space<vmem>>, %arg4: memref<8x1024xf32, #tpu.memory_space<vmem>>, %arg5: memref<8x1xf32, #tpu.memory_space<vmem>>, %arg6: memref<8x1xf32, #tpu.memory_space<vmem>>, %arg7: memref<8x1xf32, #tpu.memory_space<vmem>>) attributes {dimension_semantics = [#tpu.dimension_semantics<parallel>, #tpu.dimension_semantics<arbitrary>], iteration_bounds = array<i64: 1, 1>, scalar_prefetch = 0 : i64, scratch_operands = 2 : i64, tpu.core_type = #tpu.core_type<tc>, window_params = [{transform_indices = @transform_0, window_bounds = array<i64: 8, 1024>}, {transform_indices = @transform_1, window_bounds = array<i64: 8, 1024>}, {transform_indices = @transform_2, window_bounds = array<i64: 8, 1024>}, {transform_indices = @transform_3, window_bounds = array<i64: 8, 1>}]} {
    %c0_i32 = arith.constant 0 : i32
    %0 = arith.cmpi eq, %arg1, %c0_i32 : i32
    %1 = arith.extui %0 : i1 to i32
    %c0_i32_0 = arith.constant 0 : i32
    %2 = arith.cmpi ne, %1, %c0_i32_0 : i32
    scf.if %2 {
      %cst_17 = arith.constant 0.000000e+00 : f32
      %23 = vector.broadcast %cst_17 : f32 to vector<8x1xf32>
      %c0_18 = arith.constant 0 : index
      %c0_19 = arith.constant 0 : index
      %24 = vector.load %arg6[%c0_18, %c0_19] : memref<8x1xf32, #tpu.memory_space<vmem>>, vector<8x1xf32>
      tpu.vector_store %arg6[%c0_18, %c0_19], %23 {strides = array<i32>} : memref<8x1xf32, #tpu.memory_space<vmem>>, vector<8x1xf32>,
      %cst_20 = arith.constant 0.000000e+00 : f32
      %25 = vector.broadcast %cst_20 : f32 to vector<8x1xf32>
      %c0_21 = arith.constant 0 : index
      %c0_22 = arith.constant 0 : index
      %26 = vector.load %arg7[%c0_21, %c0_22] : memref<8x1xf32, #tpu.memory_space<vmem>>, vector<8x1xf32>
      tpu.vector_store %arg7[%c0_21, %c0_22], %25 {strides = array<i32>} : memref<8x1xf32, #tpu.memory_space<vmem>>, vector<8x1xf32>,
    } else {
    }
    %c0 = arith.constant 0 : index
    %c0_1 = arith.constant 0 : index
    %3 = vector.load %arg2[%c0, %c0_1] : memref<8x1024xf32, #tpu.memory_space<vmem>>, vector<8x1024xf32>
    %c0_2 = arith.constant 0 : index
    %c0_3 = arith.constant 0 : index
    %4 = vector.load %arg3[%c0_2, %c0_3] : memref<8x1024xf32, #tpu.memory_space<vmem>>, vector<8x1024xf32>
    %c0_4 = arith.constant 0 : index
    %c0_5 = arith.constant 0 : index
    %5 = vector.load %arg4[%c0_4, %c0_5] : memref<8x1024xf32, #tpu.memory_space<vmem>>, vector<8x1024xf32>
    %6 = arith.subf %3, %4 : vector<8x1024xf32>
    %7 = arith.subf %3, %5 : vector<8x1024xf32>
    %c0_6 = arith.constant 0 : index
    %c0_7 = arith.constant 0 : index
    %8 = vector.load %arg6[%c0_6, %c0_7] : memref<8x1xf32, #tpu.memory_space<vmem>>, vector<8x1xf32>
    %9 = arith.mulf %6, %6 : vector<8x1024xf32>
    %cst = arith.constant dense<0.000000e+00> : vector<8xf32>
    %10 = vector.multi_reduction <add>, %9, %cst [1] : vector<8x1024xf32> to vector<8xf32>
    %11 = vector.shape_cast %10 : vector<8xf32> to vector<8x1xf32>
    %12 = arith.addf %8, %11 : vector<8x1xf32>
    %c0_8 = arith.constant 0 : index
    %c0_9 = arith.constant 0 : index
    %13 = vector.load %arg6[%c0_8, %c0_9] : memref<8x1xf32, #tpu.memory_space<vmem>>, vector<8x1xf32>
    tpu.vector_store %arg6[%c0_8, %c0_9], %12 {strides = array<i32>} : memref<8x1xf32, #tpu.memory_space<vmem>>, vector<8x1xf32>,
    %c0_10 = arith.constant 0 : index
    %c0_11 = arith.constant 0 : index
    %14 = vector.load %arg7[%c0_10, %c0_11] : memref<8x1xf32, #tpu.memory_space<vmem>>, vector<8x1xf32>
    %15 = arith.mulf %7, %7 : vector<8x1024xf32>
    %cst_12 = arith.constant dense<0.000000e+00> : vector<8xf32>
    %16 = vector.multi_reduction <add>, %15, %cst_12 [1] : vector<8x1024xf32> to vector<8xf32>
    %17 = vector.shape_cast %16 : vector<8xf32> to vector<8x1xf32>
    %18 = arith.addf %14, %17 : vector<8x1xf32>
    %c0_13 = arith.constant 0 : index
    %c0_14 = arith.constant 0 : index
    %19 = vector.load %arg7[%c0_13, %c0_14] : memref<8x1xf32, #tpu.memory_space<vmem>>, vector<8x1xf32>
    tpu.vector_store %arg7[%c0_13, %c0_14], %18 {strides = array<i32>} : memref<8x1xf32, #tpu.memory_space<vmem>>, vector<8x1xf32>,
    %c0_i32_15 = arith.constant 0 : i32
    %20 = arith.cmpi eq, %arg1, %c0_i32_15 : i32
    %21 = arith.extui %20 : i1 to i32
    %c0_i32_16 = arith.constant 0 : i32
    %22 = arith.cmpi ne, %21, %c0_i32_16 : i32
    scf.if %22 {
      %c0_17 = arith.constant 0 : index
      %c0_18 = arith.constant 0 : index
      %23 = vector.load %arg6[%c0_17, %c0_18] : memref<8x1xf32, #tpu.memory_space<vmem>>, vector<8x1xf32>
      %24 = math.sqrt %23 : vector<8x1xf32>
      %c0_19 = arith.constant 0 : index
      %c0_20 = arith.constant 0 : index
      %25 = vector.load %arg7[%c0_19, %c0_20] : memref<8x1xf32, #tpu.memory_space<vmem>>, vector<8x1xf32>
      %26 = math.sqrt %25 : vector<8x1xf32>
      %27 = arith.subf %24, %26 : vector<8x1xf32>
      %cst_21 = arith.constant 1.000000e+00 : f32
      %28 = vector.broadcast %cst_21 : f32 to vector<8x1xf32>
      %29 = arith.addf %27, %28 : vector<8x1xf32>
      %cst_22 = arith.constant 0.000000e+00 : f32
      %30 = vector.broadcast %cst_22 : f32 to vector<8x1xf32>
      %31 = arith.maximumf %29, %30 : vector<8x1xf32>
      %c0_23 = arith.constant 0 : index
      %c0_24 = arith.constant 0 : index
      %32 = vector.load %arg5[%c0_23, %c0_24] : memref<8x1xf32, #tpu.memory_space<vmem>>, vector<8x1xf32>
      tpu.vector_store %arg5[%c0_23, %c0_24], %31 {strides = array<i32>} : memref<8x1xf32, #tpu.memory_space<vmem>>, vector<8x1xf32>,
    } else {
    }
    return
  }
  func.func @transform_0(%arg0: i32, %arg1: i32) -> (i32, i32) {
    %c0_i32 = arith.constant 0 : i32
    return %arg0, %arg1 : i32, i32
  }
  func.func @transform_1(%arg0: i32, %arg1: i32) -> (i32, i32) {
    %c0_i32 = arith.constant 0 : i32
    return %arg0, %arg1 : i32, i32
  }
  func.func @transform_2(%arg0: i32, %arg1: i32) -> (i32, i32) {
    %c0_i32 = arith.constant 0 : i32
    return %arg0, %arg1 : i32, i32
  }
  func.func @transform_3(%arg0: i32, %arg1: i32) -> (i32, i32) {
    %c0_i32 = arith.constant 0 : i32
    %c0_i32_0 = arith.constant 0 : i32
    return %arg0, %c0_i32 : i32, i32
  }
}

</mosaic_0001>

<bundles_post_ra>
// kernel: tpu_custom_call.1
= control target key start
LH: loop header
LB: loop body
LE: loop exit
PB: predicated region body
PF: predicated region fallthrough
CT: control target
= control target key end

     0   :  { %8 = vsyncpa [#allocation5], 0  ;;  %s414_s0 = inlined_call_operand.hbm [shape: f32[4,1024], index: 0, kind: input, shape index: {}]   ;;  %s415_s1 = inlined_call_operand.hbm [shape: f32[4,1024], index: 1, kind: input, shape index: {}]   ;;  %s416_s2 = inlined_call_operand.hbm [shape: f32[4,1024], index: 2, kind: input, shape index: {}]   ;;  %s417_s3 = inlined_call_operand.vmem [shape: f32[4,1], index: 3, kind: output, shape index: {}]  }
   0x1   :  { %9 = vsyncpa [#allocation7], 0 }
   0x2   :  { %14 = vsyncadd [#allocation5], 512  ;;  %s335_s12 = smov [#allocation4]   ;;  %s265_s16 = scalar_lea.hbm %s414_s0, 512 }
   0x3   :  { %s15_s13 = sshll.u32 %s335_s12, 4  ;;  %p266_p0 = scmp.ne.s32.totalorder %s414_s0, %s265_s16  ;;  %s16_s13 = int_to_ptr.vmem [resolvable:$true] %s15_s13 }
   0x4   :  { %p269_p1 = scmp.lt.u32.totalorder %s265_s16, %s414_s0 }
   0x6   :  { %p271_p2 = pnand %p269_p1, %p266_p0 }
   0x8   :  { %274 = shalt.err (!%p271_p2)
}
   0x9   :  { %s275_s21 = scalar_lea.vmem %s16_s13, 512  ;;  %s279_s22 = scalar_lea.vmem %s16_s13, 1024 }
   0xa   :  { %p276_p3 = scmp.ne.s32.totalorder %s16_s13, %s275_s21  ;;  %p280_p4 = scmp.lt.s32.totalorder %s16_s13, %s16_s13 }
   0xb   :  { %p281_p5 = scmp.lt.s32.totalorder %s279_s22, %s275_s21 }
   0xd   :  { %p282_p6 = por %p281_p5, %p280_p4 }
   0xf   :  { %p283_p7 = pnand %p282_p6, %p276_p3 }
  0x11   :  { %286 = shalt.err (!%p283_p7)
}
  0x12   :  { %s336_s23 = smov 512   ;;  %s337_s24 = smov 32  }
  0x13   :  { %21 = dma.hbm_to_vmem [thread:$0]  %s414_s0, 512, %s16_s13, [#allocation5], %s336_s23, %s336_s23, %s337_s24  }
  0x14   :  { %26 = vsyncadd [#allocation7], 512  ;;  %s338_s27 = smov [#allocation6]   ;;  %s287_s4 = scalar_lea.hbm %s415_s1, 512 }
  0x15   :  { %s27_s28 = sshll.u32 %s338_s27, 4  ;;  %p288_p8 = scmp.ne.s32.totalorder %s415_s1, %s287_s4  ;;  %s28_s28 = int_to_ptr.vmem [resolvable:$true] %s27_s28 }
  0x16   :  { %p291_p9 = scmp.lt.u32.totalorder %s287_s4, %s415_s1 }
  0x18   :  { %p293_p10 = pnand %p291_p9, %p288_p8 }
  0x1a   :  { %296 = shalt.err (!%p293_p10)
}
  0x1b   :  { %s297_s9 = scalar_lea.vmem %s28_s28, 512  ;;  %s301_s0 = scalar_lea.vmem %s28_s28, 1024 }
  0x1c   :  { %p298_p11 = scmp.ne.s32.totalorder %s28_s28, %s297_s9  ;;  %p302_p12 = scmp.lt.s32.totalorder %s28_s28, %s28_s28 }
  0x1d   :  { %p303_p13 = scmp.lt.s32.totalorder %s301_s0, %s297_s9 }
  0x1f   :  { %p304_p0 = por %p303_p13, %p302_p12 }
  0x21   :  { %p305_p1 = pnand %p304_p0, %p298_p11 }
  0x23   :  { %308 = shalt.err (!%p305_p1)
}
  0x24   :  { %33 = dma.hbm_to_vmem [thread:$0]  %s415_s1, 512, %s28_s28, [#allocation7], %s336_s23, %s336_s23, %s337_s24  }
  0x25   :  { %38 = vsyncadd [#allocation7], 512  ;;  %s339_s12 = smov [#allocation8]   ;;  %s309_s16 = scalar_lea.hbm %s416_s2, 512 }
  0x26   :  { %s39_s13 = sshll.u32 %s339_s12, 4  ;;  %p310_p2 = scmp.ne.s32.totalorder %s416_s2, %s309_s16  ;;  %s40_s13 = int_to_ptr.vmem [resolvable:$true] %s39_s13 }
  0x27   :  { %p313_p3 = scmp.lt.u32.totalorder %s309_s16, %s416_s2 }
  0x29   :  { %p315_p4 = pnand %p313_p3, %p310_p2 }
  0x2b   :  { %318 = shalt.err (!%p315_p4)
}
  0x2c   :  { %s319_s21 = scalar_lea.vmem %s40_s13, 512  ;;  %s323_s1 = scalar_lea.vmem %s40_s13, 1024 }
  0x2d   :  { %p320_p5 = scmp.ne.s32.totalorder %s40_s13, %s319_s21  ;;  %p324_p6 = scmp.lt.s32.totalorder %s40_s13, %s40_s13 }
  0x2e   :  { %p325_p7 = scmp.lt.s32.totalorder %s323_s1, %s319_s21 }
  0x30   :  { %p326_p8 = por %p325_p7, %p324_p6 }
  0x32   :  { %p327_p9 = pnand %p326_p8, %p320_p5 }
  0x34   :  { %330 = shalt.err (!%p327_p9)
}
  0x35   :  { %45 = dma.hbm_to_vmem [thread:$0]  %s416_s2, 512, %s40_s13, [#allocation7], %s336_s23, %s336_s23, %s337_s24  }
  0x36   :  { %331 = dma.done.wait [#allocation5], 1024  }
  0x37   :  { %332 = vsyncadd [#allocation5], 4294966272 }
  0x38   :  { %333 = dma.done.wait [#allocation7], 2048  }
  0x39   :  { %334 = vsyncadd [#allocation7], 4294965248  ;;  %vm59_vm0 = vcmask 7168   ;;  %v340_v0 = vmov 0.0   ;;  %v62_v1 = vld [vmem:[#allocation4] sm:$0xff]  ;;  %v63_v2 = vld [vmem:[#allocation4 + $0x8] sm:$0xff] }
  0x3a   :  { %60 = vst.msk [vmem:[#allocation2] sm:$0xff] %vm59_vm0, %v340_v0  ;;  %61 = vst.msk [vmem:[#allocation3] sm:$0xff] %vm59_vm0, %v340_v0  ;;  %v64_v3 = vld [vmem:[#allocation4 + $0x10] sm:$0xff]  ;;  %v65_v4 = vld [vmem:[#allocation4 + $0x18] sm:$0xff] }
  0x3b   :  { %v66_v5 = vld [vmem:[#allocation4 + $0x20] sm:$0xff]  ;;  %v67_v6 = vld [vmem:[#allocation4 + $0x28] sm:$0xff]  ;;  %v68_v7 = vld [vmem:[#allocation4 + $0x30] sm:$0xff] }
  0x3c   :  { %v70_v8 = vld [vmem:[#allocation6] sm:$0xff]  ;;  %v69_v9 = vld [vmem:[#allocation4 + $0x38] sm:$0xff]  ;;  %v71_v10 = vld [vmem:[#allocation6 + $0x8] sm:$0xff] }
  0x3d   :  { %v72_v11 = vld [vmem:[#allocation6 + $0x10] sm:$0xff]  ;;  %v73_v12 = vld [vmem:[#allocation6 + $0x18] sm:$0xff]  ;;  %v86_v13 = vsub.f32 %v62_v1, %v70_v8  ;;  %v74_v14 = vld [vmem:[#allocation6 + $0x20] sm:$0xff]  ;;  %v87_v17 = vsub.f32 %v63_v2, %v71_v10 }
  0x3e   :  { %v75_v15 = vld [vmem:[#allocation6 + $0x28] sm:$0xff]  ;;  %v76_v16 = vld [vmem:[#allocation6 + $0x30] sm:$0xff]  ;;  %v88_v18 = vsub.f32 %v64_v3, %v72_v11  ;;  %v77_v19 = vld [vmem:[#allocation6 + $0x38] sm:$0xff]  ;;  %v90_v20 = vsub.f32 %v66_v5, %v74_v14  ;;  %v89_v26 = vsub.f32 %v65_v4, %v73_v12 }
  0x3f   :  { %v91_v21 = vsub.f32 %v67_v6, %v75_v15  ;;  %v92_v22 = vsub.f32 %v68_v7, %v76_v16  ;;  %v103_v23 = vmul.f32 %v86_v13, %v86_v13  ;;  %v78_v24 = vld [vmem:[#allocation8] sm:$0xff]  ;;  %v79_v25 = vld [vmem:[#allocation8 + $0x8] sm:$0xff]  ;;  %v104_v27 = vmul.f32 %v87_v17, %v87_v17  ;;  %v80_v30 = vld [vmem:[#allocation8 + $0x10] sm:$0xff] }
  0x40   :  { %v107_v28 = vmul.f32 %v90_v20, %v90_v20  ;;  %v93_v31 = vsub.f32 %v69_v9, %v77_v19  ;;  %v105_v32 = vmul.f32 %v88_v18, %v88_v18  ;;  %v82_v33 = vld [vmem:[#allocation8 + $0x20] sm:$0xff]  ;;  %v83_v34 = vld [vmem:[#allocation8 + $0x28] sm:$0xff]  ;;  %v84_v35 = vld [vmem:[#allocation8 + $0x30] sm:$0xff]  ;;  %v94_v36 = vsub.f32 %v62_v1, %v78_v24 }
  0x41   :  { %v108_v29 = vmul.f32 %v91_v21, %v91_v21  ;;  %v95_v37 = vsub.f32 %v63_v2, %v79_v25  ;;  %v109_v38 = vmul.f32 %v92_v22, %v92_v22  ;;  %v81_v42 = vld [vmem:[#allocation8 + $0x18] sm:$0xff]  ;;  %v106_v43 = vmul.f32 %v89_v26, %v89_v26 }
  0x42   :  { %v119_v39 = vcombine.low %v103_v23, %v107_v28  ;;  %v120_v40 = vcombine.high %v103_v23, %v107_v28  ;;  %v96_v45 = vsub.f32 %v64_v3, %v80_v30  ;;  %v85_v47 = vld [vmem:[#allocation8 + $0x38] sm:$0xff]  ;;  %v98_v48 = vsub.f32 %v66_v5, %v82_v33  ;;  %v102_v23 = vld [vmem:[#allocation2] sm:$0xff] }
  0x43   :  { %v121_v41 = vcombine.low %v104_v27, %v108_v29  ;;  %v122_v44 = vcombine.high %v104_v27, %v108_v29  ;;  %v99_v49 = vsub.f32 %v67_v6, %v83_v34  ;;  %v100_v50 = vsub.f32 %v68_v7, %v84_v35  ;;  %v147_v26 = vld [vmem:[#allocation3] sm:$0xff] }
  0x44   :  { %v135_v46 = vadd.f32 %v120_v40, %v119_v39  ;;  %v110_v51 = vmul.f32 %v93_v31, %v93_v31  ;;  %v97_v52 = vsub.f32 %v65_v4, %v81_v42  ;;  %v148_v53 = vmul.f32 %v94_v36, %v94_v36 }
  0x45   :  { %v149_v54 = vmul.f32 %v95_v37, %v95_v37  ;;  %v123_v55 = vcombine.low %v105_v32, %v109_v38  ;;  %v152_v57 = vmul.f32 %v98_v48, %v98_v48  ;;  %v153_v58 = vmul.f32 %v99_v49, %v99_v49 }
  0x46   :  { %v136_v56 = vadd.f32 %v135_v46, %v121_v41  ;;  %v124_v59 = vcombine.high %v105_v32, %v109_v38  ;;  %v101_v60 = vsub.f32 %v69_v9, %v85_v47  ;;  %v150_v61 = vmul.f32 %v96_v45, %v96_v45 }
  0x47   :  { %v154_v62 = vmul.f32 %v100_v50, %v100_v50  ;;  %v164_v0 = vcombine.low %v148_v53, %v152_v57  ;;  %v165_v1 = vcombine.high %v148_v53, %v152_v57  ;;  %v166_v2 = vcombine.low %v149_v54, %v153_v58 }
  0x48   :  { %v137_v63 = vadd.f32 %v136_v56, %v122_v44  ;;  %v125_v3 = vcombine.low %v106_v43, %v110_v51  ;;  %v167_v6 = vcombine.high %v149_v54, %v153_v58  ;;  %v126_v8 = vcombine.high %v106_v43, %v110_v51 }
  0x49   :  { %v180_v7 = vadd.f32 %v165_v1, %v164_v0  ;;  %v151_v4 = vmul.f32 %v97_v52, %v97_v52  ;;  %v155_v11 = vmul.f32 %v101_v60, %v101_v60  ;;  %v168_v12 = vcombine.low %v150_v61, %v154_v62 }
  0x4a   :  { %v138_v5 = vadd.f32 %v137_v63, %v123_v55  ;;  %v169_v15 = vcombine.high %v150_v61, %v154_v62 }
  0x4b   :  { %v181_v13 = vadd.f32 %v180_v7, %v166_v2  ;;  %v170_v17 = vcombine.low %v151_v4, %v155_v11  ;;  %v171_v19 = vcombine.high %v151_v4, %v155_v11 }
  0x4c   :  { %v139_v10 = vadd.f32 %v138_v5, %v124_v59 }
  0x4d   :  { %v182_v16 = vadd.f32 %v181_v13, %v167_v6 }
  0x4e   :  { %v140_v14 = vadd.f32 %v139_v10, %v125_v3 }
  0x4f   :  { %v183_v18 = vadd.f32 %v182_v16, %v168_v12 }
  0x50   :  { %v141_v9 = vadd.f32 %v140_v14, %v126_v8 }
  0x51   :  { %v184_v20 = vadd.f32 %v183_v18, %v169_v15 }
  0x52   :  { %142 = vadd.xlane.f32.xlu0 %v141_v9 }
  0x53   :  { %v185_v21 = vadd.f32 %v184_v20, %v170_v17 }
  0x55   :  { %v186_v22 = vadd.f32 %v185_v21, %v171_v19 }
  0x57   :  { %187 = vadd.xlane.f32.xlu0 %v186_v22 }
  0xdf   :  { %v143_v24 = vpop.xlane.xlu0 %142 }
  0xe0   :  { %v144_v25 = vadd.f32 %v143_v24, %v102_v23 }
  0xe2   :  { %146 = vst.msk [vmem:[#allocation2] sm:$0xff] %vm59_vm0, %v144_v25 }
  0xe4   :  { %v188_v27 = vpop.xlane.xlu0 %187 }
  0xe5   :  { %v189_v28 = vadd.f32 %v188_v27, %v147_v26 }
  0xe7   :  { %190 = vst.msk [vmem:[#allocation3] sm:$0xff] %vm59_vm0, %v189_v28 }
  0xe9   :  { %v194_v29 = vld [vmem:[#allocation2] sm:$0xff] }
  0xea   :  { %261 = vrsqrt.f32 %v194_v29  ;;  %vm197_vm1 = vcmp.eq.f32.partialorder %v194_v29, inf  ;;  %v200_v36 = vand.u32 2147483648, %v194_v29  ;;  %vm199_vm3 = vcmp.eq.f32.partialorder %v194_v29, 0.0 }
  0xee   :  { %v202_v30 = vld [vmem:[#allocation3] sm:$0xff] }
  0xef   :  { %263 = vrsqrt.f32 %v202_v30  ;;  %vm205_vm2 = vcmp.eq.f32.partialorder %v202_v30, inf  ;;  %v208_v37 = vand.u32 2147483648, %v202_v30  ;;  %vm207_vm4 = vcmp.eq.f32.partialorder %v202_v30, 0.0 }
  0xf4   :  { %v262_v31 = vpop.eup %261 }
  0xf5   :  { %v196_v32 = vmul.f32 %v262_v31, %v194_v29 }
  0xf7   :  { %v198_v34 = vsel %vm197_vm1, %v194_v29, %v196_v32 }
  0xf8   :  { %v201_v39 = vsel %vm199_vm3, %v200_v36, %v198_v34 }
  0xf9   :  { %v264_v33 = vpop.eup %263 }
  0xfa   :  { %v204_v35 = vmul.f32 %v264_v33, %v202_v30 }
  0xfc   :  { %v206_v38 = vsel %vm205_vm2, %v202_v30, %v204_v35 }
  0xfd   :  { %v209_v40 = vsel %vm207_vm4, %v208_v37, %v206_v38 }
  0xfe   :  { %v210_v41 = vsub.f32 %v201_v39, %v209_v40 }
 0x100   :  { %v211_v42 = vadd.f32 1.0, %v210_v41 }
 0x102   :  { %v212_v43 = vmax.f32 %v211_v42, 0.0 }
 0x104   :  { %213 = vst.msk [vmem:[#allocation9] sm:$0xff] %vm59_vm0, %v212_v43 }
 0x10b   :  { %v231_v44 = vld [vmem:[#allocation9] sm:$0xf] }
 0x10c   :  { %232 = vst [vmem:[%s417_s3] sm:$0xf] %v231_v44 }
 0x10d   :  { %249 = vsyncpa [#allocation5], 1 }
 0x10e   :  { %250 = vsyncpa [#allocation7], 1 }

</bundles_post_ra>
